<compile_context>
chip_gen: v7x
topology: tpu7x:2x2x1
jax: 0.10.0
libtpu: 0.0.40
codegen_flags: <defaults>
</compile_context>

<pallas_src>
import math
import jax
import jax.numpy as jnp
from jax.experimental import pallas as pl
from jax.experimental.pallas import tpu as pltpu


# ---------------------------------------------------------------------------
# Kernels
# ---------------------------------------------------------------------------

def _linear_kernel_f32(x_ref, w_ref, b_ref, o_ref):
    """f32 output: o_ref doubles as the accumulator (VMEM-resident across the K axis)."""
    @pl.when(pl.program_id(2) == 0)
    def _():
        o_ref[...] = jnp.broadcast_to(b_ref[...].astype(jnp.float32), o_ref.shape)

    o_ref[...] += jnp.dot(x_ref[...], w_ref[...], preferred_element_type=jnp.float32)


def _linear_kernel_acc(x_ref, w_ref, b_ref, o_ref, acc_ref):
    """Non-f32 output: f32 accumulator scratch, single cast in the epilogue."""
    @pl.when(pl.program_id(2) == 0)
    def _():
        acc_ref[...] = jnp.broadcast_to(b_ref[...].astype(jnp.float32), acc_ref.shape)

    acc_ref[...] += jnp.dot(x_ref[...], w_ref[...], preferred_element_type=jnp.float32)

    @pl.when(pl.program_id(2) == pl.num_programs(2) - 1)
    def _():
        o_ref[...] = acc_ref[...].astype(o_ref.dtype)


# ---------------------------------------------------------------------------
# Helpers
# ---------------------------------------------------------------------------

def _round_up(x, m):
    return ((x + m - 1) // m) * m


def _pick_tile_k(K, preferred, align=128):
    """Largest multiple of `align` <= preferred that divides K evenly, else full K.

    K must tile evenly: a partial reduction block would fold undefined padding into
    valid outputs.
    """
    if K <= preferred:
        return K
    t = (preferred // align) * align
    while t >= align:
        if K % t == 0:
            return t
        t -= align
    return K


def _vmem_budget_bytes():
    """Generation-aware scoped-VMEM cap: physical capacity minus headroom for Mosaic."""
    try:
        cap = pltpu.get_tpu_info().vmem_capacity_bytes
    except Exception:
        cap = 64 << 20  # conservative fallback: smallest per-core VMEM (v7x)
    return max(32 << 20, cap - (16 << 20))


def _tile_footprint(tm, tn, tk, x_b, w_b, o_b, use_scratch):
    # double-buffered x / w / out tiles + bias tile (+ optional f32 accumulator)
    f = 2 * tm * tk * x_b + 2 * tk * tn * w_b + 2 * tm * tn * o_b + 2 * tn * w_b
    if use_scratch:
        f += tm * tn * 4
    return f


# ---------------------------------------------------------------------------
# Param prep (one-time, hoisted out of the per-call hot path)
# ---------------------------------------------------------------------------

def prepare_linear_params(weight, bias):
    """One-time relayout of PyTorch-style params for the kernel.

    weight (out_size, in_size) -> (in_size, out_size) = (K, N); bias (out,) -> (1, out).
    Do this ONCE at init / param creation, not per forward call.
    """
    return jnp.asarray(weight).T, jnp.asarray(bias).reshape(1, -1)


def init_linear_params(key, in_size, out_size, dtype=jnp.float32):
    """Deterministic init matching init_weights(): xavier_uniform weight, bias=0.01."""
    bound = math.sqrt(6.0 / (in_size + out_size))
    weight = jax.random.uniform(
        key, (out_size, in_size), dtype=dtype, minval=-bound, maxval=bound
    )
    bias = jnp.full((out_size,), 0.01, dtype=dtype)
    return weight, bias


# ---------------------------------------------------------------------------
# Forward
# ---------------------------------------------------------------------------

def linear_pallas(x, w_kn, bias2d, *, tile_m=512, tile_n=1024, tile_k=1024):
    """y = x @ w_kn + bias (== x @ weight.T + bias), matching nn.Linear semantics.

    x: (..., in_size); w_kn: (in_size, out_size) pre-transposed weight; bias2d: (1, out_size).
    """
    K, N = w_kn.shape
    orig_shape = x.shape
    x2d = x.reshape(-1, K)
    M = x2d.shape[0]

    out_dtype = x2d.dtype
    use_scratch = out_dtype != jnp.float32

    x_b = jnp.dtype(x2d.dtype).itemsize
    w_b = jnp.dtype(w_kn.dtype).itemsize
    o_b = jnp.dtype(out_dtype).itemsize

    budget = _vmem_budget_bytes()

    # --- tile selection -----------------------------------------------------
    # M / N tolerate partial trailing blocks (Pallas masks the write-back); K must
    # divide evenly. N tiles are lane-dense (multiples of 128) unless N itself is small.
    tm = M if M <= tile_m else tile_m
    if N <= 128:
        tn = N  # single full-extent block (legal even when N % 128 != 0)
    else:
        tn = min(tile_n, _round_up(N, 128))
    tk = _pick_tile_k(K, tile_k)

    # Shrink tiles (largest dims first) if the double-buffered footprint exceeds the
    # generation-aware VMEM budget. Rarely triggers with the default tile sizes.
    while _tile_footprint(tm, tn, tk, x_b, w_b, o_b, use_scratch) > budget:
        if tn > 128 and tn >= tm:
            tn = _round_up(tn // 2, 128)
        elif tm > 128:
            tm = _round_up(tm // 2, 8)
        elif tk > 128 and (tk // 2) % 128 == 0 and K % (tk // 2) == 0:
            tk //= 2
        elif tn > 128:
            tn = _round_up(tn // 2, 128)
        else:
            break

    # v7x has 2 TensorCores: keep both busy by ensuring >= 2 parallel blocks when possible.
    if pl.cdiv(M, tm) * pl.cdiv(N, tn) < 2:
        if N > 128 and tn > 128:
            tn = max(128, _round_up(pl.cdiv(N, 2), 128))
        elif M > 8 and tm > 8:
            tm = _round_up(pl.cdiv(M, 2), 8)

    grid = (pl.cdiv(M, tm), pl.cdiv(N, tn), K // tk)

    footprint = _tile_footprint(tm, tn, tk, x_b, w_b, o_b, use_scratch)
    vmem_limit = int(min(budget, max(2 * footprint + (2 << 20), 32 << 20)))

    if use_scratch:
        kernel = _linear_kernel_acc
        scratch_shapes = [pltpu.VMEM((tm, tn), jnp.float32)]
    else:
        kernel = _linear_kernel_f32
        scratch_shapes = []

    out = pl.pallas_call(
        kernel,
        out_shape=jax.ShapeDtypeStruct((M, N), out_dtype),
        grid=grid,
        in_specs=[
            pl.BlockSpec((tm, tk), lambda i, j, k: (i, k)),
            pl.BlockSpec((tk, tn), lambda i, j, k: (k, j)),
            pl.BlockSpec((1, tn), lambda i, j, k: (0, j)),
        ],
        out_specs=pl.BlockSpec((tm, tn), lambda i, j, k: (i, j)),
        scratch_shapes=scratch_shapes,
        compiler_params=pltpu.CompilerParams(
            dimension_semantics=("parallel", "parallel", "arbitrary"),
            vmem_limit_bytes=vmem_limit,
        ),
    )(x2d, w_kn, bias2d)

    return out.reshape(*orig_shape[:-1], N)


# ---------------------------------------------------------------------------
# Demo / sanity check
# ---------------------------------------------------------------------------

if __name__ == "__main__":
    key = jax.random.PRNGKey(0)
    k_x, k_w = jax.random.split(key)

    batch, seq, in_size, out_size = 2, 8, 32, 64
    x = jax.random.normal(k_x, (batch, seq, in_size), dtype=jnp.float32)
    weight, bias = init_linear_params(k_w, in_size, out_size)

    # One-time relayout (hoisted out of the hot path; never repeated per call).
    w_kn, bias2d = prepare_linear_params(weight, bias)

    y = linear_pallas(x, w_kn, bias2d)
    jax.block_until_ready(y)

    # Sanity check against plain JAX reference of nn.Linear semantics.
    y_ref = x @ weight.T + bias
    assert y.shape == (batch, seq, out_size)
    assert jnp.allclose(y, y_ref, atol=1e-5, rtol=1e-5)

    print("KERNEL_OK")
</pallas_src>

<mosaic_0001>
module attributes {stable_mosaic.version = 11 : i64} {
  func.func @_linear_kernel_f32(%arg0: i32, %arg1: i32, %arg2: i32, %arg3: memref<8x32xf32, #tpu.memory_space<vmem>>, %arg4: memref<32x64xf32, #tpu.memory_space<vmem>>, %arg5: memref<1x64xf32, #tpu.memory_space<vmem>>, %arg6: memref<8x64xf32, #tpu.memory_space<vmem>>) attributes {dimension_semantics = [#tpu.dimension_semantics<parallel>, #tpu.dimension_semantics<parallel>, #tpu.dimension_semantics<arbitrary>], iteration_bounds = array<i64: 2, 1, 1>, scalar_prefetch = 0 : i64, scratch_operands = 0 : i64, tpu.core_type = #tpu.core_type<tc>, window_params = [{transform_indices = @transform_0, window_bounds = array<i64: 8, 32>}, {transform_indices = @transform_1, window_bounds = array<i64: 32, 64>}, {transform_indices = @transform_2, window_bounds = array<i64: 1, 64>}, {transform_indices = @transform_3, window_bounds = array<i64: 8, 64>}]} {
    %c0_i32 = arith.constant 0 : i32
    %0 = arith.cmpi eq, %arg2, %c0_i32 : i32
    %1 = arith.extui %0 : i1 to i32
    %c0_i32_0 = arith.constant 0 : i32
    %2 = arith.cmpi ne, %1, %c0_i32_0 : i32
    scf.if %2 {
      %c0_8 = arith.constant 0 : index
      %c0_9 = arith.constant 0 : index
      %9 = vector.load %arg5[%c0_8, %c0_9] : memref<1x64xf32, #tpu.memory_space<vmem>>, vector<1x64xf32>
      %10 = vector.shape_cast %9 : vector<1x64xf32> to vector<1x64xf32>
      %11 = vector.broadcast %10 : vector<1x64xf32> to vector<8x64xf32>
      %c0_10 = arith.constant 0 : index
      %c0_11 = arith.constant 0 : index
      %12 = vector.load %arg6[%c0_10, %c0_11] : memref<8x64xf32, #tpu.memory_space<vmem>>, vector<8x64xf32>
      tpu.vector_store %arg6[%c0_10, %c0_11], %11 {strides = array<i32>} : memref<8x64xf32, #tpu.memory_space<vmem>>, vector<8x64xf32>,
    } else {
    }
    %c0 = arith.constant 0 : index
    %c0_1 = arith.constant 0 : index
    %3 = vector.load %arg6[%c0, %c0_1] : memref<8x64xf32, #tpu.memory_space<vmem>>, vector<8x64xf32>
    %c0_2 = arith.constant 0 : index
    %c0_3 = arith.constant 0 : index
    %4 = vector.load %arg3[%c0_2, %c0_3] : memref<8x32xf32, #tpu.memory_space<vmem>>, vector<8x32xf32>
    %c0_4 = arith.constant 0 : index
    %c0_5 = arith.constant 0 : index
    %5 = vector.load %arg4[%c0_4, %c0_5] : memref<32x64xf32, #tpu.memory_space<vmem>>, vector<32x64xf32>
    %cst = arith.constant dense<0.000000e+00> : vector<8x64xf32>
    %6 = tpu.matmul %4, %5, %cst {dimension_numbers = #tpu.dot_dimension_numbers<[1], [0], [0], [1], [0, 0, 1, 1], [], []>} : vector<8x32xf32>, vector<32x64xf32>, vector<8x64xf32> -> vector<8x64xf32>
    %7 = arith.addf %3, %6 : vector<8x64xf32>
    %c0_6 = arith.constant 0 : index
    %c0_7 = arith.constant 0 : index
    %8 = vector.load %arg6[%c0_6, %c0_7] : memref<8x64xf32, #tpu.memory_space<vmem>>, vector<8x64xf32>
    tpu.vector_store %arg6[%c0_6, %c0_7], %7 {strides = array<i32>} : memref<8x64xf32, #tpu.memory_space<vmem>>, vector<8x64xf32>,
    return
  }
  func.func @transform_0(%arg0: i32, %arg1: i32, %arg2: i32) -> (i32, i32) {
    %c0_i32 = arith.constant 0 : i32
    return %arg0, %arg2 : i32, i32
  }
  func.func @transform_1(%arg0: i32, %arg1: i32, %arg2: i32) -> (i32, i32) {
    %c0_i32 = arith.constant 0 : i32
    return %arg2, %arg1 : i32, i32
  }
  func.func @transform_2(%arg0: i32, %arg1: i32, %arg2: i32) -> (i32, i32) {
    %c0_i32 = arith.constant 0 : i32
    %c0_i32_0 = arith.constant 0 : i32
    return %c0_i32, %arg1 : i32, i32
  }
  func.func @transform_3(%arg0: i32, %arg1: i32, %arg2: i32) -> (i32, i32) {
    %c0_i32 = arith.constant 0 : i32
    return %arg0, %arg1 : i32, i32
  }
}

</mosaic_0001>

<bundles_post_ra>
// kernel: tpu_custom_call.1
= control target key start
LH: loop header
LB: loop body
LE: loop exit
PB: predicated region body
PF: predicated region fallthrough
CT: control target
= control target key end

     0   :  { %8 = vsyncpa [#allocation3], 0  ;;  %s982_s0 = inlined_call_operand.hbm [shape: f32[16,32], index: 0, kind: input, shape index: {}]   ;;  %s983_s1 = inlined_call_operand.hbm [shape: f32[32,64], index: 1, kind: input, shape index: {}]   ;;  %s984_s2 = inlined_call_operand.vmem [shape: f32[1,64], index: 2, kind: input, shape index: {}]   ;;  %s985_s3 = inlined_call_operand.hbm [shape: f32[16,64], index: 3, kind: output, shape index: {}]  }
   0x1   :  { %10 = vsyncpa [#allocation3 + $0x1], 0 }
   0x2   :  { %11 = vsyncpa [#allocation6], 0 }
   0x3   :  { %12 = vsyncpa [#allocation4], 0 }
   0x4   :  { %14 = vsyncpa [#allocation4 + $0x1], 0  ;;  %s763_s12 = smov 0   ;;  %s765_s13 = smov 0  }
   0x5   :  { %s767_s14 = smov 0   ;;  %s769_s15 = smov 0  }
   0x6   :  { %s771_s16 = smov 0   ;;  %s773_s17 = smov 0  }
   0x7 LB: > { %s471_s18 = sadd.s32 4294967295, %s733_s17   ;;  %s472_s19 = sadd.s32 4294967294, %s733_s17   ;;  %s733_s17 = sphi %s773_s17, %s20_s17   ;;  %s729_s16 = sphi %s771_s16, %s1009_s16   ;;  %s725_s15 = sphi %s769_s15, %s1008_s15   ;;  %s721_s14 = sphi %s767_s14, %s1007_s14   ;;  %s717_s13 = sphi %s765_s13, %s1006_s13   ;;  %s713_s12 = sphi %s763_s12, %s1005_s12  }
   0x8   : > { %p61_p0 = scmp.ne.s32.totalorder %s717_s13, %s713_s12  ;;  %p797_p1 = scmp.eq.s32.totalorder %s471_s18, 0 }
   0x9   : > { %p801_p2 = scmp.eq.s32.totalorder %s471_s18, 1  ;;  %p147_p3 = scmp.eq.s32.totalorder %s472_s19, 1 }
   0xa   : > { %s990_s20 = scalar_select %p797_p1, 1, 0 }
   0xb   : > { %s991_s21 = scalar_select %p801_p2, 1, 0 }
   0xc   : > { %p807_p4 = por %p797_p1, %p61_p0  ;;  %p473_p5 = scmp.ge.s32.totalorder %s733_s17, 1 }
   0xd   : > { %p812_p6 = por %p147_p3, %p61_p0  ;;  %p154_p7 = scmp.lt.s32.totalorder %s733_s17, 3 }
   0xe   : > { %s992_s22 = scalar_select %p807_p4, 1, 0 }
   0xf   : > { %s993_s23 = scalar_select %p812_p6, 1, 0 }
  0x10   : > { %p817_p8 = pnand %p473_p5, %p154_p7  ;;  %s735_s25 = smov [#allocation5]  }
  0x11   : > { %s170_s26 = sshll.u32 %s735_s25, 4  ;;  %s39_s28 = sadd.s32 1, %s729_s16  ;;  %s171_s26 = int_to_ptr.vmem [resolvable:$true] %s170_s26 }
  0x12   : > { %s994_s24 = scalar_select %p817_p8, 1, 0 }
  0x13   : > { %p519_p9 = pneg %p817_p8  ;;  %s589_s4 = scalar_lea.hbm %s983_s1, 512 }
  0x14   : > { %p590_p12 = scmp.ne.s32.totalorder %s983_s1, %s589_s4  ;;  %p596_p5 = scmp.lt.u32.totalorder %s589_s4, %s983_s1 }
  0x15   : > { %p826_p11 = pnand %p519_p9, %p797_p1 }
  0x17   : > { %p591_p13 = pneg %p826_p11 }
  0x19   : > { %p592_p0 = pnand %p591_p13, %p590_p12 }
  0x1b   : > { %p593_p3 = pneg %p592_p0 }
  0x1d   : > { %p598_p7 = pnand %p596_p5, %p593_p3 }
  0x1f   : > { %601 = shalt.err (!%p598_p7)
}
  0x20   : > { %s602_s9 = scalar_lea.vmem %s171_s26, 512  ;;  %p610_p1 = scmp.lt.s32.totalorder %s171_s26, %s171_s26 }
  0x21   : > { %p603_p9 = scmp.ne.s32.totalorder %s171_s26, %s602_s9  ;;  %p611_p4 = scmp.lt.s32.totalorder %s602_s9, %s602_s9 }
  0x23   : > { %p605_p10 = pnand %p603_p9, %p591_p13  ;;  %p612_p8 = por %p611_p4, %p610_p1 }
  0x25   : > { %p606_p6 = pneg %p605_p10 }
  0x27   : > { %p613_p2 = pnand %p612_p8, %p606_p6 }
  0x29   : > { %616 = shalt.err (!%p613_p2)
}
  0x2a   : > { %s736_s10 = smov 128   ;;  %s737_s11 = smov 8  }
  0x2b   : > { %522 = dma.hbm_to_vmem [thread:$0]  (!%p826_p11), %s983_s1, 512, %s171_s26, [#allocation6], %s736_s10, %s736_s10, %s737_s11  }
  0x2c   : > { %p41_p1 = scmp.ge.s32.totalorder %s39_s28, 2  ;;  %s48_s25 = sadd.s32 1, %s721_s14 }
  0x2d   : > { %p55_p2 = scmp.ne.s32.totalorder %s721_s14, %s717_s13  ;;  %p56_p4 = scmp.eq.s32.totalorder %s733_s17, 0 }
  0x2e   : > { %s1011_s28 = smov (%p41_p1, %s39_s28), 0  ;;  %p997_p8 = scmp.ne.s32.totalorder %s991_s21, 0 }
  0x2f   : > { %p853_p6 = por %p56_p4, %p55_p2  ;;  %s43_s27 = ssub.s32 %s729_s16, %s1011_s28 }
  0x30   : > { %p859_p10 = por %p997_p8, %p55_p2  ;;  %p532_p12 = scmp.lt.s32.totalorder %s733_s17, 2 }
  0x31   : > { %p46_p11 = scmp.eq.s32.totalorder %s43_s27, 0  ;;  %s190_s26 = sand.u32 1, %s721_s14  }
  0x32   : > { %s477_s4 = sshll.u32 %s190_s26, 3  ;;  %s478_s6 = sshll.u32 %s729_s16, 7 }
  0x33   : > { %s868_s5 = scalar_select %p46_p11, %s721_s14, %s48_s25  }
  0x34   : > { %s874_s9 = scalar_lea.hbm %s982_s0, %s478_s6  ;;  %s194_s21 = scalar_lea.vmem [#allocation2], %s477_s4 }
  0x35   : > { %s202_s10 = sshll.u32 %s194_s21, 4  ;;  %p880_p13 = pnand %p532_p12, %p853_p6  ;;  %s876_s10 = int_to_ptr.vmem [resolvable:$true] %s202_s10 }
  0x36   : > { %s191_s18 = scalar_lea.sflag [#allocation3], %s190_s26  ;;  %s617_s19 = scalar_lea.hbm %s874_s9, 128 }
  0x37   : > { %p618_p0 = scmp.ne.s32.totalorder %s874_s9, %s617_s19  ;;  %p619_p3 = pneg %p880_p13 }
  0x38   : > { %s622_s4 = scalar_lea.hbm %s982_s0, 256  ;;  %p623_p9 = scmp.lt.u32.totalorder %s874_s9, %s982_s0 }
  0x39   : > { %p620_p5 = pnand %p619_p3, %p618_p0  ;;  %p624_p1 = scmp.lt.u32.totalorder %s622_s4, %s617_s19 }
  0x3a   : > { %p626_p4 = scmp.lt.u32.totalorder %s617_s19, %s874_s9 }
  0x3b   : > { %p621_p7 = pneg %p620_p5  ;;  %p625_p2 = por %p624_p1, %p623_p9 }
  0x3d   : > { %p627_p6 = por %p626_p4, %p625_p2 }
  0x3f   : > { %p628_p8 = pnand %p627_p6, %p621_p7 }
  0x41   : > { %631 = shalt.err (!%p628_p8)
}
  0x42   : > { %s632_s26 = scalar_lea.vmem %s876_s10, 128  ;;  %s738_s7 = smov [#allocation2]  }
  0x43   : > { %p633_p12 = scmp.ne.s32.totalorder %s876_s10, %s632_s26  ;;  %s637_s8 = sshll.u32 %s738_s7, 4  ;;  %s638_s8 = int_to_ptr.vmem [resolvable:$false] %s637_s8 }
  0x44   : > { %s639_s21 = scalar_lea.vmem %s638_s8, 256  ;;  %p640_p5 = scmp.lt.s32.totalorder %s876_s10, %s638_s8 }
  0x45   : > { %p635_p11 = pnand %p633_p12, %p619_p3  ;;  %p641_p9 = scmp.lt.s32.totalorder %s639_s21, %s632_s26 }
  0x47   : > { %p636_p0 = pneg %p635_p11  ;;  %p642_p1 = por %p641_p9, %p640_p5 }
  0x49   : > { %p643_p2 = pnand %p642_p1, %p636_p0 }
  0x4b   : > { %646 = shalt.err (!%p643_p2)
}
  0x4c   : > { %526 = dma.hbm_to_vmem [thread:$0]  (!%p880_p13), %s874_s9, 128, %s876_s10, %s191_s18  }
  0x4d   : > { %p1000_p7 = scmp.ne.s32.totalorder %s994_s24, 0 }
  0x4e   : > { %s912_s19 = sand.u32 (!%p1000_p7), 1, %s717_s13   ;;  %p1001_p3 = scmp.ne.s32.totalorder (!%p1000_p7), %s992_s22, 0 }
  0x4f   : > { %211 = sbr.rel (%p1000_p7) target bundleno = 329 (0x149), region = 32  ;;  %s480_s25 = sshll.u32 (!%p1000_p7), %s912_s19, 3 }
  0x50   : > { %s214_s27 = scalar_lea.sflag (!%p1000_p7), [#allocation3], %s912_s19  ;;  %s217_s4 = scalar_lea.vmem (!%p1000_p7), [#allocation2], %s480_s25 }
  0x56   : > { %700 = dma.done.wait (%p1001_p3), %s214_s27, 128  }
  0x57   : > { %702 = vsyncadd (%p1001_p3), %s214_s27, 4294967168  ;;  %p1002_p4 = scmp.ne.s32.totalorder %s990_s20, 0 }
  0x59   : > { %704 = dma.done.wait (%p1002_p4), [#allocation6], 512  }
  0x5a   : > { %706 = vsyncadd (%p1002_p4), [#allocation6], 4294966784  ;;  %v739_v0 = vmov 0.0|0.0   ;;  %vm740_vm0 = vmmov 0   ;;  %v741_v1 = vmov 0.0   ;;  %vm262_vm1 = vcmask 523264  }
  0x5b   : > { %505 = vmatprep.subr.bf16.mxu0 %v739_v0  ;;  %502 = vmatprep.mubr.msk.f32.mxu0 %vm740_vm0, %v741_v1  ;;  %v266_v2 = vld [vmem:[#allocation5] sm:$0xff]  ;;  %v267_v3 = vld [vmem:[#allocation5 + $0x8] sm:$0xff]  ;;  %v268_v4 = vld [vmem:[#allocation5 + $0x10] sm:$0xff]  ;;  %s246_s9 = scalar_lea.vmem [#allocation7], %s480_s25  ;;  %vm270_vm2 = vcmask 261120   ;;  %s486_s20 = sshll.u32 %s725_s15, 7 }
  0x5c   : > { %v506_v5 = vpack.c.bf16 %v267_v3, %v266_v2  ;;  %v269_v6 = vld [vmem:[#allocation5 + $0x18] sm:$0xff]  ;;  %v483_v7 = vld [vmem:[%s984_s2] ss:$0 sm:$0xff]  ;;  %s362_s10 = sshll.u32 %s246_s9, 4  ;;  %s932_s29 = scalar_lea.hbm %s985_s3, %s486_s20  ;;  %s934_s10 = int_to_ptr.vmem [resolvable:$true] %s362_s10 }
  0x5d   : > { %263 = vst.msk [vmem:[%s246_s9] sm:$0xff] %vm262_vm1, %v483_v7  ;;  %v509_v8 = vpack.c.bf16 %v269_v6, %v268_v4  ;;  %v265_v9 = vld [vmem:[%s217_s4] sm:$0xff]  ;;  %s348_s6 = scalar_lea.sflag [#allocation4], %s912_s19  ;;  %s647_s26 = scalar_lea.vmem %s934_s10, 128 }
  0x5e   : > { %507 = vmatpush3.bf16.msra.mxu0 %v506_v5  ;;  %p648_p13 = scmp.ne.s32.totalorder %s934_s10, %s647_s26  ;;  %s742_s15 = smov [#allocation7]  }
  0x5f   : > { %508 = vmatprep.subr.bf16.mxu0 %v739_v0  ;;  %s651_s7 = sshll.u32 %s742_s15, 4  ;;  %s652_s7 = int_to_ptr.vmem [resolvable:$false] %s651_s7 }
  0x60   : > { %p649_p6 = pnand %p648_p13, %p859_p10  ;;  %s653_s8 = scalar_lea.vmem %s652_s7, 256 }
  0x61   : > { %p654_p12 = scmp.lt.s32.totalorder %s934_s10, %s652_s7  ;;  %p655_p11 = scmp.lt.s32.totalorder %s653_s8, %s647_s26 }
  0x62   : > { %510 = vmatpush3.bf16.msra.mxu0 %v509_v8  ;;  %p650_p8 = pneg %p649_p6 }
  0x63   : > { %p656_p0 = por %p655_p11, %p654_p12 }
  0x64   : > { %v264_v10 = vld [vmem:[%s246_s9] sm:$0xff] }
  0x65   : > { %503 = vmatmul.mubr.msk.f32.vlgmr.msra.gmra.mrb[0].mxu0 %vm270_vm2, %v265_v9  ;;  %p657_p5 = pnand %p656_p0, %p650_p8 }
 0x138   : > { %v340_v11 = vpop.f32.mrb[0].mxu0 }
 0x139   : > { %v344_v12 = vadd.f32 %v340_v11, %v264_v10  ;;  %v504_v13 = vpop.f32.mrb[1].mxu0 }
 0x13b   : > { %346 = vst.msk [vmem:[%s246_s9] sm:$0xff] %vm262_vm1, %v344_v12 }
 0x13c   : > { %660 = shalt.err (!%p657_p5)
}
 0x13d   : > { %s661_s21 = scalar_lea.hbm %s932_s29, 128  ;;  %s665_s27 = scalar_lea.hbm %s985_s3, 256 }
 0x13e   : > { %p662_p9 = scmp.ne.s32.totalorder %s932_s29, %s661_s21  ;;  %p666_p7 = scmp.lt.u32.totalorder %s932_s29, %s985_s3 }
 0x13f   : > { %p667_p3 = scmp.lt.u32.totalorder %s665_s27, %s661_s21  ;;  %p669_p13 = scmp.lt.u32.totalorder %s661_s21, %s932_s29 }
 0x140   : > { %p663_p1 = pnand %p662_p9, %p859_p10 }
 0x141   : > { %p668_p4 = por %p667_p3, %p666_p7 }
 0x142   : > { %p664_p2 = pneg %p663_p1 }
 0x143   : > { %p670_p6 = por %p669_p13, %p668_p4 }
 0x145   : > { %p671_p8 = pnand %p670_p6, %p664_p2 }
 0x147   : > { %674 = shalt.err (!%p671_p8)
}
 0x148   : > { %517 = dma.vmem_to_hbm [thread:$0]  (%p859_p10), %s934_s10, 128, %s932_s29, %s348_s6  }
 0x149 PF: > { %s374_s24 = sand.u32 1, %s713_s12   ;;  %p1003_p12 = scmp.ne.s32.totalorder %s993_s23, 0 }
 0x14a   : > { %p1004_p11 = scmp.ge.s32.totalorder %s733_s17, 2  ;;  %s375_s9 = scalar_lea.sflag [#allocation4], %s374_s24 }
 0x14c   : > { %p528_p0 = pnand %p1004_p11, %p1003_p12 }
 0x14e   : > { %708 = dma.done.wait (!%p528_p0), %s375_s9, 128  }
 0x14f   : > { %710 = vsyncadd (!%p528_p0), %s375_s9, 4294967168  ;;  %s20_s17 = sadd.s32 1, %s733_s17   ;;  %s1005_s12 = smov %s717_s13 }
 0x150   : > { %p17_p5 = scmp.ge.s32.totalorder %s20_s17, 4   ;;  %s1006_s13 = smov %s721_s14 }
 0x151   : > { %s1007_s14 = smov %s868_s5  ;;  %s1008_s15 = smov %s729_s16 }
 0x152   : > { %s1009_s16 = smov %s1011_s28  ;;  %19 = sbr.rel (!%p17_p5) target bundleno = 7 (0x7), region = 89 }
 0x159   :  { %380 = vsyncpa [#allocation3], 1 }
 0x15a   :  { %382 = vsyncpa [#allocation3 + $0x1], 1 }
 0x15b   :  { %383 = vsyncpa [#allocation6], 1 }
 0x15c   :  { %384 = vsyncpa [#allocation4], 1 }
 0x15d   :  { %386 = vsyncpa [#allocation4 + $0x1], 1 }

</bundles_post_ra>
